<compile_context>
chip_gen: v5e
topology: v5e:2x2
jax: 0.10.0
libtpu: 0.0.40
codegen_flags: <defaults>
</compile_context>

<pallas_src>
import numpy as np
import jax
import jax.numpy as jnp
from jax import lax
from jax.experimental import pallas as pl
from jax.experimental.pallas import tpu as pltpu

LRELU_SLOPE = 0.2
EPS = 1e-5
K = 4  # conv / blur kernel size


def _blur_downsample_matrix(L):
    """D (L_out, L) with D @ v == 1-D BlurPool(reflect-pad(v, (1,2)), filt=[1,3,3,1]/8, stride=2)."""
    a = np.array([1.0, 3.0, 3.0, 1.0])
    f = a / a.sum()
    pad_l, pad_r = 1, 2                    # antialiased_cnns.BlurPool pad sizes for filt_size=4
    Lp = L + pad_l + pad_r
    P = np.zeros((Lp, L), np.float32)      # reflection-padding selection matrix
    for j in range(Lp):
        i = j - pad_l
        if i < 0:
            i = -i
        elif i >= L:
            i = 2 * (L - 1) - i
        P[j, i] = 1.0
    L_out = (Lp - K) // 2 + 1
    B = np.zeros((L_out, Lp), np.float32)  # stride-2 blur matrix
    for o in range(L_out):
        for t in range(K):
            B[o, 2 * o + t] = f[t]
    return (B @ P).astype(np.float32)


def _kernel(x_ref, m_ref, s_ref, st_ref, rm_ref, dh_ref, dw_ref, o_ref):
    f32 = jnp.float32
    # ---- Conv2d(k=4, s=1, p=1, no bias): ONE bf16 MXU matmul; kh AND kw folded into the contraction ----
    conv = jnp.dot(x_ref[...], m_ref[...], preferred_element_type=f32)       # (bb*Hp, C_out*Wo) f32

    # ---- InstanceNorm2d (no affine, biased var, eps=1e-5): thin reducers, no (C_out*Wo)^2 table ----
    #   s : (CW, C_out)     per-channel lane-block sum
    #   rm : (bb*Hp, bb*Hp) per-sample row average over the Ho valid rows (pad rows excluded), incl. 1/(Ho*Wo)
    #   st : (C_out, CW)    broadcast channel stats back across each channel's Wo lanes
    mean_bc = jnp.dot(jnp.dot(rm_ref[...], jnp.dot(conv, s_ref[...], preferred_element_type=f32),
                              preferred_element_type=f32),
                      st_ref[...], preferred_element_type=f32)               # (bb*Hp, CW)
    cen = conv - mean_bc
    var_bc = jnp.dot(jnp.dot(rm_ref[...], jnp.dot(cen * cen, s_ref[...], preferred_element_type=f32),
                             preferred_element_type=f32),
                     st_ref[...], preferred_element_type=f32)                # (bb*Hp, CW)
    y = cen * lax.rsqrt(var_bc + EPS)

    # ---- LeakyReLU(0.2), f32 on the VPU ----
    y = jnp.where(y >= 0, y, LRELU_SLOPE * y)

    # ---- BlurPool (reflect pad + 4x4 blur, stride 2): 2 matmuls for all samples & channels ----
    t = jnp.dot(dh_ref[...], y, preferred_element_type=f32)                  # (bb*Ho_out, CW)
    o_ref[...] = jnp.dot(t, dw_ref[...], preferred_element_type=f32).astype(o_ref.dtype)


def _pick_batch_block(N, Ho_out, max_bb=8):
    """Largest divisor of N (<= max_bb) whose blocks stay (8,128)-legal."""
    for bb in range(min(N, max_bb), 0, -1):
        if N % bb:
            continue
        if N // bb == 1 or (bb * Ho_out) % 8 == 0:
            return bb
    return 1


def unet_down(x, w, batch_block=None):
    """x: (N, C_in, H, W) f32, w: (C_out, C_in, 4, 4) f32 -> (N, C_out, Hd, Wd) f32."""
    N, C_in, H, W = x.shape
    C_out = w.shape[0]
    Ho, Wo = H - 1, W - 1                      # Conv2d(k=4, s=1, p=1) output size
    Ho_out = (Ho + 3 - K) // 2 + 1             # BlurPool output sizes
    Wo_out = (Wo + 3 - K) // 2 + 1
    CW = C_out * Wo
    KC = K * C_in * W                          # folded contraction depth (kh, ci, q) = 256 at toy sizes
    Hp = ((Ho + 7) // 8) * 8                   # per-sample rows padded to a sublane multiple
    bb = batch_block or _pick_batch_block(N, Ho_out)
    assert N % bb == 0
    grid = N // bb                             # on v7x, prefer N/bb to stay a multiple of 2 when N allows

    # ---- LHS: kh-folded, H-only zero-padded rows, samples stacked on sublanes, bf16 ----
    # xw[n*Hp + p, kh*C_in*W + ci*W + q] = x_padH[n, ci, p+kh, q]  (rows p >= Ho are zero padding)
    xh = jnp.pad(x.astype(jnp.float32), ((0, 0), (0, 0), (1, 1), (0, 0)))       # (N, C_in, H+2, W)
    xk = jnp.stack([xh[:, :, kh:kh + Ho, :] for kh in range(K)], axis=1)        # (N, K, C_in, Ho, W)
    xk = jnp.transpose(xk, (0, 3, 1, 2, 4)).reshape(N, Ho, KC)
    xw = jnp.pad(xk, ((0, 0), (0, Hp - Ho), (0, 0))).reshape(N * Hp, KC).astype(jnp.bfloat16)
    # NOTE: the kh fold duplicates input rows 4x in HBM; at real resolutions consider assembling the
    # shifted copies in-kernel to keep this layer on the HBM roofline.

    # ---- RHS: conv weights with the kw gather AND kh folded into the contraction (bf16) ----
    #   m[kh*C_in*W + ci*W + q, co*Wo + j] = w[co, ci, kh, q+1-j]  for 0 <= q+1-j < K
    place = np.zeros((W, Wo, K), np.float32)
    for j in range(Wo):
        for kw in range(K):
            q = j + kw - 1
            if 0 <= q < W:
                place[q, j, kw] = 1.0
    m = jnp.einsum("oihk,qjk->hiqoj", w.astype(jnp.float32), jnp.asarray(place))
    m = m.reshape(KC, CW).astype(jnp.bfloat16)                                  # (256, 120) at toy sizes

    # ---- small f32 selection / reduction matrices (thin: no (C_out*Wo)^2 tables) ----
    s = np.kron(np.eye(C_out, dtype=np.float32), np.ones((Wo, 1), np.float32))      # (CW, C_out)
    st = np.kron(np.eye(C_out, dtype=np.float32), np.ones((1, Wo), np.float32))     # (C_out, CW)
    blk = np.zeros((Hp, Hp), np.float32)
    blk[:, :Ho] = 1.0 / (Ho * Wo)
    rmean = np.kron(np.eye(bb, dtype=np.float32), blk)                              # (bb*Hp, bb*Hp)
    dh_pad = np.zeros((Ho_out, Hp), np.float32)
    dh_pad[:, :Ho] = _blur_downsample_matrix(Ho)
    dhb = np.kron(np.eye(bb, dtype=np.float32), dh_pad)                             # (bb*Ho_out, bb*Hp)
    # TODO(synk): kron(I_C_out, DwT) is only 1/C_out dense -- split lanes into channel groups at large C_out.
    dwbd = np.kron(np.eye(C_out, dtype=np.float32), _blur_downsample_matrix(Wo).T)  # (CW, C_out*Wo_out)

    out_flat = pl.pallas_call(
        _kernel,
        out_shape=jax.ShapeDtypeStruct((N * Ho_out, C_out * Wo_out), jnp.float32),
        grid=(grid,),
        in_specs=[
            pl.BlockSpec((bb * Hp, KC), lambda n: (n, 0)),           # per-step input slab (bf16)
            pl.BlockSpec((KC, CW), lambda n: (0, 0)),                # kh+kw folded conv weights (bf16)
            pl.BlockSpec((CW, C_out), lambda n: (0, 0)),             # per-channel lane-sum reducer
            pl.BlockSpec((C_out, CW), lambda n: (0, 0)),             # lane broadcast-back
            pl.BlockSpec((bb * Hp, bb * Hp), lambda n: (0, 0)),      # per-sample row mean (pad rows masked)
            pl.BlockSpec((bb * Ho_out, bb * Hp), lambda n: (0, 0)),  # row blur/downsample (per-sample blocks)
            pl.BlockSpec((CW, C_out * Wo_out), lambda n: (0, 0)),    # block-diag col blur/downsample
        ],
        out_specs=pl.BlockSpec((bb * Ho_out, C_out * Wo_out), lambda n: (n, 0)),
        compiler_params=pltpu.CompilerParams(
            dimension_semantics=("parallel",),
            vmem_limit_bytes=32 * 1024 * 1024,
        ),
    )(xw, m, jnp.asarray(s), jnp.asarray(st), jnp.asarray(rmean), jnp.asarray(dhb), jnp.asarray(dwbd))

    # lane-dense (N*Ho_out, C_out*Wo_out) -> NCHW (layout plumbing only, outside the kernel)
    return jnp.transpose(out_flat.reshape(N, Ho_out, C_out, Wo_out), (0, 2, 1, 3))


def ref_unet_down(x, w):
    """Pure-JAX reference mirroring the PyTorch module."""
    y = lax.conv_general_dilated(x, w, (1, 1), ((1, 1), (1, 1)),
                                 dimension_numbers=("NCHW", "OIHW", "NCHW"))
    mean = y.mean(axis=(2, 3), keepdims=True)
    var = ((y - mean) ** 2).mean(axis=(2, 3), keepdims=True)
    y = (y - mean) / jnp.sqrt(var + EPS)
    y = jnp.where(y >= 0, y, LRELU_SLOPE * y)
    yp = jnp.pad(y, ((0, 0), (0, 0), (1, 2), (1, 2)), mode="reflect")
    a = jnp.array([1.0, 3.0, 3.0, 1.0], jnp.float32)
    f2 = jnp.outer(a, a) / jnp.sum(jnp.outer(a, a))
    C = y.shape[1]
    fw = jnp.tile(f2[None, None], (C, 1, 1, 1))
    return lax.conv_general_dilated(yp, fw, (2, 2), "VALID",
                                    dimension_numbers=("NCHW", "OIHW", "NCHW"),
                                    feature_group_count=C)


if __name__ == "__main__":
    key = jax.random.PRNGKey(0)
    k1, k2 = jax.random.split(key)
    N, C_in, C_out, H, W = 2, 4, 8, 16, 16
    x = jax.random.normal(k1, (N, C_in, H, W), jnp.float32)
    w = jax.random.normal(k2, (C_out, C_in, K, K), jnp.float32) * 0.1   # deterministic synthetic weights

    out = jax.block_until_ready(unet_down(x, w))
    ref = ref_unet_down(x, w)

    assert out.shape == (N, C_out, 8, 8), out.shape
    assert bool(jnp.all(jnp.isfinite(out)))
    max_err = float(jnp.max(jnp.abs(out - ref)))
    # Tolerance sized for bf16 conv operands (f32 accumulation + f32 norm/blur): expect ~1e-2 worst case.
    assert max_err < 2e-2, f"max abs err {max_err}"
    print("KERNEL_OK")
</pallas_src>

<mosaic_0001>
module attributes {stable_mosaic.version = 11 : i64} {
  func.func @_kernel(%arg0: i32, %arg1: memref<32x256xbf16, #tpu.memory_space<vmem>>, %arg2: memref<256x120xbf16, #tpu.memory_space<vmem>>, %arg3: memref<120x8xf32, #tpu.memory_space<vmem>>, %arg4: memref<8x120xf32, #tpu.memory_space<vmem>>, %arg5: memref<32x32xf32, #tpu.memory_space<vmem>>, %arg6: memref<16x32xf32, #tpu.memory_space<vmem>>, %arg7: memref<120x64xf32, #tpu.memory_space<vmem>>, %arg8: memref<16x64xf32, #tpu.memory_space<vmem>>) attributes {dimension_semantics = [#tpu.dimension_semantics<parallel>], iteration_bounds = array<i64: 1>, scalar_prefetch = 0 : i64, scratch_operands = 0 : i64, tpu.core_type = #tpu.core_type<tc>, window_params = [{transform_indices = @transform_0, window_bounds = array<i64: 32, 256>}, {pipeline_mode = #tpu.pipeline_mode<synchronous>, transform_indices = @transform_1, window_bounds = array<i64: 256, 120>}, {pipeline_mode = #tpu.pipeline_mode<synchronous>, transform_indices = @transform_2, window_bounds = array<i64: 120, 8>}, {pipeline_mode = #tpu.pipeline_mode<synchronous>, transform_indices = @transform_3, window_bounds = array<i64: 8, 120>}, {pipeline_mode = #tpu.pipeline_mode<synchronous>, transform_indices = @transform_4, window_bounds = array<i64: 32, 32>}, {pipeline_mode = #tpu.pipeline_mode<synchronous>, transform_indices = @transform_5, window_bounds = array<i64: 16, 32>}, {pipeline_mode = #tpu.pipeline_mode<synchronous>, transform_indices = @transform_6, window_bounds = array<i64: 120, 64>}, {transform_indices = @transform_7, window_bounds = array<i64: 16, 64>}]} {
    %c0 = arith.constant 0 : index
    %c0_0 = arith.constant 0 : index
    %0 = vector.load %arg1[%c0, %c0_0] : memref<32x256xbf16, #tpu.memory_space<vmem>>, vector<32x256xbf16>
    %c0_1 = arith.constant 0 : index
    %c0_2 = arith.constant 0 : index
    %1 = vector.load %arg2[%c0_1, %c0_2] : memref<256x120xbf16, #tpu.memory_space<vmem>>, vector<256x120xbf16>
    %cst = arith.constant dense<0.000000e+00> : vector<32x120xf32>
    %2 = tpu.matmul %0, %1, %cst {dimension_numbers = #tpu.dot_dimension_numbers<[1], [0], [0], [1], [0, 0, 1, 1], [], []>} : vector<32x256xbf16>, vector<256x120xbf16>, vector<32x120xf32> -> vector<32x120xf32>
    %c0_3 = arith.constant 0 : index
    %c0_4 = arith.constant 0 : index
    %3 = vector.load %arg5[%c0_3, %c0_4] : memref<32x32xf32, #tpu.memory_space<vmem>>, vector<32x32xf32>
    %c0_5 = arith.constant 0 : index
    %c0_6 = arith.constant 0 : index
    %4 = vector.load %arg3[%c0_5, %c0_6] : memref<120x8xf32, #tpu.memory_space<vmem>>, vector<120x8xf32>
    %cst_7 = arith.constant dense<0.000000e+00> : vector<32x8xf32>
    %5 = tpu.matmul %2, %4, %cst_7 {dimension_numbers = #tpu.dot_dimension_numbers<[1], [0], [0], [1], [0, 0, 1, 1], [], []>} : vector<32x120xf32>, vector<120x8xf32>, vector<32x8xf32> -> vector<32x8xf32>
    %cst_8 = arith.constant dense<0.000000e+00> : vector<32x8xf32>
    %6 = tpu.matmul %3, %5, %cst_8 {dimension_numbers = #tpu.dot_dimension_numbers<[1], [0], [0], [1], [0, 0, 1, 1], [], []>} : vector<32x32xf32>, vector<32x8xf32>, vector<32x8xf32> -> vector<32x8xf32>
    %c0_9 = arith.constant 0 : index
    %c0_10 = arith.constant 0 : index
    %7 = vector.load %arg4[%c0_9, %c0_10] : memref<8x120xf32, #tpu.memory_space<vmem>>, vector<8x120xf32>
    %cst_11 = arith.constant dense<0.000000e+00> : vector<32x120xf32>
    %8 = tpu.matmul %6, %7, %cst_11 {dimension_numbers = #tpu.dot_dimension_numbers<[1], [0], [0], [1], [0, 0, 1, 1], [], []>} : vector<32x8xf32>, vector<8x120xf32>, vector<32x120xf32> -> vector<32x120xf32>
    %9 = arith.subf %2, %8 : vector<32x120xf32>
    %c0_12 = arith.constant 0 : index
    %c0_13 = arith.constant 0 : index
    %10 = vector.load %arg5[%c0_12, %c0_13] : memref<32x32xf32, #tpu.memory_space<vmem>>, vector<32x32xf32>
    %11 = arith.mulf %9, %9 : vector<32x120xf32>
    %c0_14 = arith.constant 0 : index
    %c0_15 = arith.constant 0 : index
    %12 = vector.load %arg3[%c0_14, %c0_15] : memref<120x8xf32, #tpu.memory_space<vmem>>, vector<120x8xf32>
    %cst_16 = arith.constant dense<0.000000e+00> : vector<32x8xf32>
    %13 = tpu.matmul %11, %12, %cst_16 {dimension_numbers = #tpu.dot_dimension_numbers<[1], [0], [0], [1], [0, 0, 1, 1], [], []>} : vector<32x120xf32>, vector<120x8xf32>, vector<32x8xf32> -> vector<32x8xf32>
    %cst_17 = arith.constant dense<0.000000e+00> : vector<32x8xf32>
    %14 = tpu.matmul %10, %13, %cst_17 {dimension_numbers = #tpu.dot_dimension_numbers<[1], [0], [0], [1], [0, 0, 1, 1], [], []>} : vector<32x32xf32>, vector<32x8xf32>, vector<32x8xf32> -> vector<32x8xf32>
    %c0_18 = arith.constant 0 : index
    %c0_19 = arith.constant 0 : index
    %15 = vector.load %arg4[%c0_18, %c0_19] : memref<8x120xf32, #tpu.memory_space<vmem>>, vector<8x120xf32>
    %cst_20 = arith.constant dense<0.000000e+00> : vector<32x120xf32>
    %16 = tpu.matmul %14, %15, %cst_20 {dimension_numbers = #tpu.dot_dimension_numbers<[1], [0], [0], [1], [0, 0, 1, 1], [], []>} : vector<32x8xf32>, vector<8x120xf32>, vector<32x120xf32> -> vector<32x120xf32>
    %cst_21 = arith.constant 9.99999974E-6 : f32
    %17 = vector.broadcast %cst_21 : f32 to vector<32x120xf32>
    %18 = arith.addf %16, %17 : vector<32x120xf32>
    %19 = math.rsqrt %18 : vector<32x120xf32>
    %20 = arith.mulf %9, %19 : vector<32x120xf32>
    %cst_22 = arith.constant 0.000000e+00 : f32
    %21 = vector.broadcast %cst_22 : f32 to vector<32x120xf32>
    %22 = arith.cmpf oge, %20, %21 : vector<32x120xf32>
    %cst_23 = arith.constant 2.000000e-01 : f32
    %23 = vector.broadcast %cst_23 : f32 to vector<32x120xf32>
    %24 = arith.mulf %23, %20 : vector<32x120xf32>
    %25 = arith.select %22, %20, %24 : vector<32x120xi1>, vector<32x120xf32>
    %c0_24 = arith.constant 0 : index
    %c0_25 = arith.constant 0 : index
    %26 = vector.load %arg6[%c0_24, %c0_25] : memref<16x32xf32, #tpu.memory_space<vmem>>, vector<16x32xf32>
    %cst_26 = arith.constant dense<0.000000e+00> : vector<16x120xf32>
    %27 = tpu.matmul %26, %25, %cst_26 {dimension_numbers = #tpu.dot_dimension_numbers<[1], [0], [0], [1], [0, 0, 1, 1], [], []>} : vector<16x32xf32>, vector<32x120xf32>, vector<16x120xf32> -> vector<16x120xf32>
    %c0_27 = arith.constant 0 : index
    %c0_28 = arith.constant 0 : index
    %28 = vector.load %arg7[%c0_27, %c0_28] : memref<120x64xf32, #tpu.memory_space<vmem>>, vector<120x64xf32>
    %cst_29 = arith.constant dense<0.000000e+00> : vector<16x64xf32>
    %29 = tpu.matmul %27, %28, %cst_29 {dimension_numbers = #tpu.dot_dimension_numbers<[1], [0], [0], [1], [0, 0, 1, 1], [], []>} : vector<16x120xf32>, vector<120x64xf32>, vector<16x64xf32> -> vector<16x64xf32>
    %c0_30 = arith.constant 0 : index
    %c0_31 = arith.constant 0 : index
    %30 = vector.load %arg8[%c0_30, %c0_31] : memref<16x64xf32, #tpu.memory_space<vmem>>, vector<16x64xf32>
    tpu.vector_store %arg8[%c0_30, %c0_31], %29 {strides = array<i32>} : memref<16x64xf32, #tpu.memory_space<vmem>>, vector<16x64xf32>,
    return
  }
  func.func @transform_0(%arg0: i32) -> (i32, i32) {
    %c0_i32 = arith.constant 0 : i32
    %c0_i32_0 = arith.constant 0 : i32
    return %arg0, %c0_i32 : i32, i32
  }
  func.func @transform_1(%arg0: i32) -> (i32, i32) {
    %c0_i32 = arith.constant 0 : i32
    %c0_i32_0 = arith.constant 0 : i32
    %c0_i32_1 = arith.constant 0 : i32
    return %c0_i32, %c0_i32_0 : i32, i32
  }
  func.func @transform_2(%arg0: i32) -> (i32, i32) {
    %c0_i32 = arith.constant 0 : i32
    %c0_i32_0 = arith.constant 0 : i32
    %c0_i32_1 = arith.constant 0 : i32
    return %c0_i32, %c0_i32_0 : i32, i32
  }
  func.func @transform_3(%arg0: i32) -> (i32, i32) {
    %c0_i32 = arith.constant 0 : i32
    %c0_i32_0 = arith.constant 0 : i32
    %c0_i32_1 = arith.constant 0 : i32
    return %c0_i32, %c0_i32_0 : i32, i32
  }
  func.func @transform_4(%arg0: i32) -> (i32, i32) {
    %c0_i32 = arith.constant 0 : i32
    %c0_i32_0 = arith.constant 0 : i32
    %c0_i32_1 = arith.constant 0 : i32
    return %c0_i32, %c0_i32_0 : i32, i32
  }
  func.func @transform_5(%arg0: i32) -> (i32, i32) {
    %c0_i32 = arith.constant 0 : i32
    %c0_i32_0 = arith.constant 0 : i32
    %c0_i32_1 = arith.constant 0 : i32
    return %c0_i32, %c0_i32_0 : i32, i32
  }
  func.func @transform_6(%arg0: i32) -> (i32, i32) {
    %c0_i32 = arith.constant 0 : i32
    %c0_i32_0 = arith.constant 0 : i32
    %c0_i32_1 = arith.constant 0 : i32
    return %c0_i32, %c0_i32_0 : i32, i32
  }
  func.func @transform_7(%arg0: i32) -> (i32, i32) {
    %c0_i32 = arith.constant 0 : i32
    %c0_i32_0 = arith.constant 0 : i32
    return %arg0, %c0_i32 : i32, i32
  }
}

</mosaic_0001>

<bundles_post_ra>
// kernel: tpu_custom_call.1
= control target key start
LH: loop header
LB: loop body
LE: loop exit
PB: predicated region body
PF: predicated region fallthrough
CT: control target
= control target key end

     0   :  { %s1095_s0 = inlined_call_operand.vmem [shape: bf16[32,256], index: 0, kind: input, shape index: {}]   ;;  %s1096_s1 = inlined_call_operand.vmem [shape: bf16[256,120], index: 1, kind: input, shape index: {}]   ;;  %s1097_s2 = inlined_call_operand.vmem [shape: f32[120,8], index: 2, kind: input, shape index: {}]   ;;  %s1098_s3 = inlined_call_operand.vmem [shape: f32[8,120], index: 3, kind: input, shape index: {}]   ;;  %s1099_s4 = inlined_call_operand.vmem [shape: f32[32,32], index: 4, kind: input, shape index: {}]   ;;  %s1100_s5 = inlined_call_operand.vmem [shape: f32[16,32], index: 5, kind: input, shape index: {}]   ;;  %s1101_s6 = inlined_call_operand.vmem [shape: f32[120,64], index: 6, kind: input, shape index: {}]   ;;  %s1102_s7 = inlined_call_operand.hbm [shape: f32[16,64], index: 7, kind: output, shape index: {}]  }
   0x1   :  { %v753_v0 = vld [vmem:[%s1096_s1 + $0x38] sm:$0xff]  ;;  %v752_v2 = vld [vmem:[%s1096_s1 + $0x30] sm:$0xff]  ;;  %v751_v4 = vld [vmem:[%s1096_s1 + $0x28] sm:$0xff] }
   0x2   :  { %v761_v1 = vld [vmem:[%s1096_s1 + $0x78] sm:$0xff]  ;;  %179 = vmatpush.bf16.msra.mxu0 %v753_v0  ;;  %v760_v3 = vld [vmem:[%s1096_s1 + $0x70] sm:$0xff]  ;;  %v759_v5 = vld [vmem:[%s1096_s1 + $0x68] sm:$0xff] }
   0x3   :  { %198 = vmatpush.bf16.msra.mxu1 %v761_v1 }
   0x6   :  { %180 = vmatpush.bf16.msra.mxu0 %v752_v2 }
   0x7   :  { %199 = vmatpush.bf16.msra.mxu1 %v760_v3 }
   0x8   :  { %12 = vsyncpa [#allocation3], 0  ;;  %v750_v6 = vld [vmem:[%s1096_s1 + $0x20] sm:$0xff]  ;;  %v749_v8 = vld [vmem:[%s1096_s1 + $0x18] sm:$0xff]  ;;  %vm236_vm0 = vcmask 982016   ;;  %vm278_vm1 = vcmask 261120  }
   0x9   :  { %v758_v7 = vld [vmem:[%s1096_s1 + $0x60] sm:$0xff]  ;;  %v757_v9 = vld [vmem:[%s1096_s1 + $0x58] sm:$0xff]  ;;  %v235_v10 = vld [vmem:[%s1097_s2 + $0x70] sm:$0xff]  ;;  %vm321_vm2 = vcmask 64512   ;;  %s799_s20 = smov [#allocation2]   ;;  %s622_s23 = sshll.u32 %s1102_s7, 4  ;;  %s623_s23 = int_to_ptr.hbm [resolvable:$true] %s622_s23 }
   0xa   :  { %181 = vmatpush.bf16.msra.mxu0 %v751_v4  ;;  %v748_v11 = vld [vmem:[%s1096_s1 + $0x10] sm:$0xff]  ;;  %v234_v13 = vld [vmem:[%s1097_s2 + $0x68] sm:$0xff]  ;;  %250 = vmatpush.msra.mxu2 %v235_v10  ;;  %v233_v14 = vld [vmem:[%s1097_s2 + $0x60] sm:$0xff]  ;;  %s620_s21 = sshll.u32 %s799_s20, 4  ;;  %s801_s24 = smov 8   ;;  %s621_s21 = int_to_ptr.vmem [resolvable:$true] %s620_s21 }
   0xb   :  { %200 = vmatpush.bf16.msra.mxu1 %v759_v5  ;;  %v756_v12 = vld [vmem:[%s1096_s1 + $0x50] sm:$0xff]  ;;  %v747_v15 = vld [vmem:[%s1096_s1 + $0x8] sm:$0xff]  ;;  %v232_v17 = vld [vmem:[%s1097_s2 + $0x58] sm:$0xff] }
   0xc   :  { %251 = vmatpush.msra.mxu2 %v234_v13  ;;  %v755_v16 = vld [vmem:[%s1096_s1 + $0x48] sm:$0xff]  ;;  %v746_v18 = vld [vmem:[%s1096_s1] sm:$0xff]  ;;  %v231_v19 = vld [vmem:[%s1097_s2 + $0x50] sm:$0xff] }
   0xd   :  { %v754_v20 = vld [vmem:[%s1096_s1 + $0x40] sm:$0xff]  ;;  %v743_v22 = vld [vmem:[%s1095_s0 + $0x4] sm:$0xf0]  ;;  %v638_v24 = vld [vmem:[%s1095_s0 + $0x8] sm:$0xf0] }
   0xe   :  { %182 = vmatpush.bf16.msra.mxu0 %v750_v6  ;;  %252 = vmatpush.msra.mxu2 %v233_v14  ;;  %v636_v21 = vld [vmem:[%s1095_s0] sm:$0xf]  ;;  %v742_v23 = vld [vmem:[%s1095_s0 + $0x4] sm:$0xf]  ;;  %v230_v25 = vld [vmem:[%s1097_s2 + $0x48] sm:$0xff] }
   0xf   :  { %201 = vmatpush.bf16.msra.mxu1 %v758_v7  ;;  %v229_v26 = vld [vmem:[%s1097_s2 + $0x40] sm:$0xff]  ;;  %v637_v27 = vor.u32 %v743_v22, %v636_v21  ;;  %v641_v28 = vor.u32 %v742_v23, %v638_v24  ;;  %v228_v29 = vld [vmem:[%s1097_s2 + $0x38] sm:$0xff]  ;;  %v227_v30 = vld [vmem:[%s1097_s2 + $0x30] sm:$0xff] }
  0x10   :  { %253 = vmatpush.msra.mxu2 %v232_v17  ;;  %v226_v31 = vld [vmem:[%s1097_s2 + $0x28] sm:$0xff]  ;;  %v225_v32 = vld [vmem:[%s1097_s2 + $0x20] sm:$0xff]  ;;  %v224_v33 = vld [vmem:[%s1097_s2 + $0x18] sm:$0xff] }
  0x11   :  { %v644_v34 = vld [vmem:[%s1095_s0 + $0x10] sm:$0xf]  ;;  %v745_v36 = vld [vmem:[%s1095_s0 + $0x14] sm:$0xf0]  ;;  %v744_v37 = vld [vmem:[%s1095_s0 + $0x14] sm:$0xf] }
  0x12   :  { %183 = vmatpush.bf16.msra.mxu0 %v749_v8  ;;  %254 = vmatpush.msra.mxu2 %v231_v19  ;;  %v223_v35 = vld [vmem:[%s1097_s2 + $0x10] sm:$0xff]  ;;  %v646_v38 = vld [vmem:[%s1095_s0 + $0x18] sm:$0xf0]  ;;  %v645_v39 = vor.u32 %v745_v36, %v644_v34  ;;  %v222_v41 = vld [vmem:[%s1097_s2 + $0x8] sm:$0xff] }
  0x13   :  { %202 = vmatpush.bf16.msra.mxu1 %v757_v9  ;;  %v649_v40 = vor.u32 %v744_v37, %v646_v38  ;;  %v221_v42 = vld [vmem:[%s1097_s2] sm:$0xff]  ;;  %v218_v61 = vld [vmem:[%s1099_s4 + $0x8] sm:$0xff]  ;;  %v219_v62 = vld [vmem:[%s1099_s4 + $0x10] sm:$0xff] }
  0x14   :  { %255 = vmatpush.msra.mxu2 %v230_v25  ;;  %v320_v59 = vld [vmem:[%s1098_s3] sm:$0xff]  ;;  %v220_v63 = vld [vmem:[%s1099_s4 + $0x18] sm:$0xff] }
  0x15   :  { %v217_v60 = vld [vmem:[%s1099_s4] sm:$0xff] }
  0x16   :  { %184 = vmatpush.bf16.msra.mxu0 %v748_v11  ;;  %256 = vmatpush.msra.mxu2 %v229_v26 }
  0x17   :  { %203 = vmatpush.bf16.msra.mxu1 %v756_v12 }
  0x18   :  { %257 = vmatpush.msra.mxu2 %v228_v29 }
  0x1a   :  { %185 = vmatpush.bf16.msra.mxu0 %v747_v15  ;;  %258 = vmatpush.msra.mxu2 %v227_v30 }
  0x1b   :  { %204 = vmatpush.bf16.msra.mxu1 %v755_v16 }
  0x1c   :  { %259 = vmatpush.msra.mxu2 %v226_v31 }
  0x1e   :  { %186 = vmatpush.bf16.msra.mxu0 %v746_v18  ;;  %260 = vmatpush.msra.mxu2 %v225_v32 }
  0x1f   :  { %205 = vmatpush.bf16.msra.mxu1 %v754_v20 }
  0x20   :  { %261 = vmatpush.msra.mxu2 %v224_v33 }
  0x21   :  { %187 = vmatmul.bf16.vlgmr.msra.gmra.mxu0 %v637_v27 }
  0x22   :  { %206 = vmatmul.bf16.vlgmr.msra.gmra.mxu1 %v641_v28  ;;  %262 = vmatpush.msra.mxu2 %v223_v35 }
  0x23   :  { %468 = vmatpush.msrb.mxu1 %v320_v59 }
  0x24   :  { %263 = vmatpush.msra.mxu2 %v222_v41 }
  0x26   :  { %264 = vmatpush.msra.mxu2 %v221_v42 }
  0x28   :  { %384 = vmatpush.msrb.mxu2 %v235_v10 }
  0x2a   :  { %385 = vmatpush.msrb.mxu2 %v234_v13 }
  0x2c   :  { %386 = vmatpush.msrb.mxu2 %v233_v14 }
  0x2e   :  { %387 = vmatpush.msrb.mxu2 %v232_v17 }
  0x30   :  { %388 = vmatpush.msrb.mxu2 %v231_v19 }
  0x31   :  { %192 = vmatmul.bf16.gmra.mxu0 %v645_v39 }
  0x32   :  { %211 = vmatmul.bf16.gmra.mxu1 %v649_v40  ;;  %389 = vmatpush.msrb.mxu2 %v230_v25 }
  0x34   :  { %390 = vmatpush.msrb.mxu2 %v229_v26 }
  0x36   :  { %391 = vmatpush.msrb.mxu2 %v228_v29 }
  0x38   :  { %392 = vmatpush.msrb.mxu2 %v227_v30 }
  0x3a   :  { %393 = vmatpush.msrb.mxu2 %v226_v31 }
  0x3c   :  { %394 = vmatpush.msrb.mxu2 %v225_v32 }
  0x3e   :  { %395 = vmatpush.msrb.mxu2 %v224_v33 }
  0x40   :  { %396 = vmatpush.msrb.mxu2 %v223_v35 }
  0x42   :  { %397 = vmatpush.msrb.mxu2 %v222_v41 }
  0x44   :  { %398 = vmatpush.msrb.mxu2 %v221_v42 }
  0x9e   :  { %v188_v43 = vpop.f32.mrf.mxu0 }
  0x9f   :  { %v207_v44 = vpop.f32.mrf.mxu1 }
  0xa0   :  { %v208_v45 = vadd.f32 %v207_v44, %v188_v43 }
  0xa2   :  { %714 = vmatmul.msk.f32.vlgmr.msra.gmra.mxu2 %vm236_vm0, %v208_v45 }
  0xa6   :  { %v190_v46 = vpop.f32.mrf.mxu0 }
  0xa7   :  { %v209_v47 = vpop.f32.mrf.mxu1 }
  0xa8   :  { %v210_v48 = vadd.f32 %v209_v47, %v190_v46  ;;  %v583_v46 = vld [vmem:[%s1101_s6 + $0x70] sm:$0xff]  ;;  %v582_v47 = vld [vmem:[%s1101_s6 + $0x68] sm:$0xff] }
  0xa9   :  { %591 = vmatpush.msra.mxu2 %v583_v46 }
  0xaa   :  { %715 = vmatmul.msk.f32.gmra.mxu2 %vm236_vm0, %v210_v48 }
  0xab   :  { %592 = vmatpush.msra.mxu2 %v582_v47 }
  0xae   :  { %v193_v49 = vpop.f32.mrf.mxu0 }
  0xaf   :  { %v212_v50 = vpop.f32.mrf.mxu1 }
  0xb0   :  { %v213_v51 = vadd.f32 %v212_v50, %v193_v49  ;;  %v581_v50 = vld [vmem:[%s1101_s6 + $0x60] sm:$0xff] }
  0xb1   :  { %593 = vmatpush.msra.mxu2 %v581_v50 }
  0xb2   :  { %716 = vmatmul.msk.f32.gmra.mxu2 %vm236_vm0, %v213_v51 }
  0xb6   :  { %v195_v52 = vpop.f32.mrf.mxu0 }
  0xb7   :  { %v214_v53 = vpop.f32.mrf.mxu1 }
  0xb8   :  { %v215_v54 = vadd.f32 %v214_v53, %v195_v52 }
  0xba   :  { %717 = vmatmul.msk.f32.gmra.mxu2 %vm236_vm0, %v215_v54 }
 0x125   :  { %v266_v55 = vpop.f32.mrf.mxu2 }
 0x12d   :  { %v269_v56 = vpop.f32.mrf.mxu2 }
 0x135   :  { %v272_v57 = vpop.f32.mrf.mxu2 }
 0x13d   :  { %v275_v58 = vpop.f32.mrf.mxu2 }
 0x13e   :  { %303 = vmatpush.msra.mxu3 %v275_v58  ;;  %v579_v58 = vld [vmem:[%s1101_s6 + $0x50] sm:$0xff] }
 0x140   :  { %304 = vmatpush.msra.mxu3 %v272_v57 }
 0x142   :  { %305 = vmatpush.msra.mxu3 %v269_v56 }
 0x144   :  { %306 = vmatpush.msra.mxu3 %v266_v55 }
 0x145   :  { %718 = vmatmul.msk.f32.vlgmr.msra.gmra.mxu3 %vm278_vm1, %v217_v60 }
 0x146   :  { %349 = vmatpush.msrb.mxu3 %v320_v59 }
 0x14d   :  { %719 = vmatmul.msk.f32.gmra.mxu3 %vm278_vm1, %v218_v61 }
 0x155   :  { %720 = vmatmul.msk.f32.gmra.mxu3 %vm278_vm1, %v219_v62 }
 0x15d   :  { %721 = vmatmul.msk.f32.gmra.mxu3 %vm278_vm1, %v220_v63 }
 0x1c8   :  { %v308_v0 = vpop.f32.mrf.mxu3 }
 0x1c9   :  { %722 = vmatmul.msk.f32.vlgmr.msrb.gmra.mxu3 %vm321_vm2, %v308_v0 }
 0x1d0   :  { %v311_v1 = vpop.f32.mrf.mxu3 }
 0x1d1   :  { %723 = vmatmul.msk.f32.gmra.mxu3 %vm321_vm2, %v311_v1 }
 0x1d8   :  { %v314_v2 = vpop.f32.mrf.mxu3 }
 0x1d9   :  { %724 = vmatmul.msk.f32.gmra.mxu3 %vm321_vm2, %v314_v2 }
 0x1e0   :  { %v317_v3 = vpop.f32.mrf.mxu3 }
 0x1e1   :  { %725 = vmatmul.msk.f32.gmra.mxu3 %vm321_vm2, %v317_v3  ;;  %v577_v3 = vld [vmem:[%s1101_s6 + $0x40] sm:$0xff] }
 0x24c   :  { %v351_v4 = vpop.f32.mrf.mxu3 }
 0x24d   :  { %v986_v5 = vsub.f32 %v208_v45, %v351_v4 }
 0x24f   :  { %v367_v6 = vmul.f32 %v986_v5, %v986_v5 }
 0x251   :  { %726 = vmatmul.msk.f32.vlgmr.msrb.gmra.mxu2 %vm236_vm0, %v367_v6 }
 0x254   :  { %v354_v7 = vpop.f32.mrf.mxu3 }
 0x255   :  { %v991_v8 = vsub.f32 %v210_v48, %v354_v7 }
 0x257   :  { %v368_v9 = vmul.f32 %v991_v8, %v991_v8 }
 0x259   :  { %727 = vmatmul.msk.f32.gmra.mxu2 %vm236_vm0, %v368_v9 }
 0x25c   :  { %v357_v10 = vpop.f32.mrf.mxu3 }
 0x25d   :  { %v996_v11 = vsub.f32 %v213_v51, %v357_v10  ;;  %v576_v10 = vld [vmem:[%s1101_s6 + $0x38] sm:$0xff] }
 0x25f   :  { %v369_v12 = vmul.f32 %v996_v11, %v996_v11 }
 0x261   :  { %728 = vmatmul.msk.f32.gmra.mxu2 %vm236_vm0, %v369_v12 }
 0x264   :  { %v360_v13 = vpop.f32.mrf.mxu3 }
 0x265   :  { %v1001_v14 = vsub.f32 %v215_v54, %v360_v13  ;;  %v580_v54 = vld [vmem:[%s1101_s6 + $0x58] sm:$0xff] }
 0x266   :  { %594 = vmatpush.msra.mxu2 %v580_v54 }
 0x267   :  { %v370_v15 = vmul.f32 %v1001_v14, %v1001_v14 }
 0x268   :  { %595 = vmatpush.msra.mxu2 %v579_v58 }
 0x269   :  { %729 = vmatmul.msk.f32.gmra.mxu2 %vm236_vm0, %v370_v15  ;;  %v575_v15 = vld [vmem:[%s1101_s6 + $0x30] sm:$0xff] }
 0x2d4   :  { %v400_v16 = vpop.f32.mrf.mxu2 }
 0x2dc   :  { %v403_v17 = vpop.f32.mrf.mxu2 }
 0x2e4   :  { %v406_v18 = vpop.f32.mrf.mxu2 }
 0x2ec   :  { %v409_v19 = vpop.f32.mrf.mxu2 }
 0x2ed   :  { %424 = vmatpush.msrb.mxu0 %v409_v19 }
 0x2ef   :  { %425 = vmatpush.msrb.mxu0 %v406_v18 }
 0x2f1   :  { %426 = vmatpush.msrb.mxu0 %v403_v17 }
 0x2f3   :  { %427 = vmatpush.msrb.mxu0 %v400_v16 }
 0x2f4   :  { %730 = vmatmul.msk.f32.vlgmr.msrb.gmra.mxu0 %vm278_vm1, %v217_v60 }
 0x2fc   :  { %731 = vmatmul.msk.f32.gmra.mxu0 %vm278_vm1, %v218_v61 }
 0x304   :  { %732 = vmatmul.msk.f32.gmra.mxu0 %vm278_vm1, %v219_v62  ;;  %v578_v62 = vld [vmem:[%s1101_s6 + $0x48] sm:$0xff] }
 0x305   :  { %596 = vmatpush.msra.mxu2 %v578_v62 }
 0x307   :  { %597 = vmatpush.msra.mxu2 %v577_v3 }
 0x309   :  { %598 = vmatpush.msra.mxu2 %v576_v10 }
 0x30b   :  { %599 = vmatpush.msra.mxu2 %v575_v15 }
 0x30c   :  { %733 = vmatmul.msk.f32.gmra.mxu0 %vm278_vm1, %v220_v63 }
 0x371   :  { %v429_v20 = vpop.f32.mrf.mxu0 }
 0x372   :  { %734 = vmatmul.msk.f32.vlgmr.msrb.gmra.mxu1 %vm321_vm2, %v429_v20  ;;  %v572_v20 = vld [vmem:[%s1101_s6 + $0x18] sm:$0xff] }
 0x379   :  { %v432_v21 = vpop.f32.mrf.mxu0 }
 0x37a   :  { %735 = vmatmul.msk.f32.gmra.mxu1 %vm321_vm2, %v432_v21  ;;  %v538_v21 = vld [vmem:[%s1100_s5] sm:$0xff] }
 0x381   :  { %v435_v22 = vpop.f32.mrf.mxu0 }
 0x382   :  { %736 = vmatmul.msk.f32.gmra.mxu1 %vm321_vm2, %v435_v22 }
 0x389   :  { %v438_v23 = vpop.f32.mrf.mxu0 }
 0x38a   :  { %737 = vmatmul.msk.f32.gmra.mxu1 %vm321_vm2, %v438_v23  ;;  %v571_v23 = vld [vmem:[%s1101_s6 + $0x10] sm:$0xff] }
 0x3ef   :  { %v470_v24 = vpop.f32.mrf.mxu1 }
 0x3f0   :  { %v471_v27 = vadd.f32 1e-05, %v470_v24  ;;  %v570_v24 = vld [vmem:[%s1101_s6 + $0x8] sm:$0xff] }
 0x3f2   :  { %vm488_vm10 = vweird.f32 %v471_v27 }
 0x3f7   :  { %v473_v25 = vpop.f32.mrf.mxu1 }
 0x3f8   :  { %v474_v26 = vadd.f32 1e-05, %v473_v25  ;;  %v569_v25 = vld [vmem:[%s1101_s6] sm:$0xff] }
 0x3fa   :  { %765 = vrsqrt.f32 %v474_v26  ;;  %vm498_vm7 = vweird.f32 %v474_v26 }
 0x3fb   :  { %767 = vrsqrt.f32 %v471_v27 }
 0x3ff   :  { %v476_v28 = vpop.f32.mrf.mxu1 }
 0x400   :  { %v477_v29 = vadd.f32 1e-05, %v476_v28  ;;  %v766_v30 = vpop.eup %765 }
 0x401   :  { %v1014_v31 = vpop.eup %767  ;;  %v493_v32 = vmul.f32 %v766_v30, %v474_v26  ;;  %vm499_vm4 = vweird.f32 %v766_v30  ;;  %v539_v26 = vld [vmem:[%s1100_s5 + $0x8] sm:$0xff]  ;;  %s800_s5 = smov 128  }
 0x402   :  { %769 = vrsqrt.f32 %v477_v29  ;;  %v483_v33 = vmul.f32 %v1014_v31, %v471_v27  ;;  %vm508_vm5 = vweird.f32 %v477_v29  ;;  %vm489_vm6 = vweird.f32 %v1014_v31  ;;  %vm500_vm11 = vmor %vm498_vm7, %vm499_vm4 }
 0x403   :  { %v494_v37 = vmul.f32 %v766_v30, %v493_v32  ;;  %vm1044_vm12 = vmor %vm488_vm10, %vm489_vm6 }
 0x404   :  { %v484_v39 = vmul.f32 %v1014_v31, %v483_v33 }
 0x405   :  { %v495_v41 = vmul.f32 0.5, %v494_v37 }
 0x406   :  { %v485_v43 = vmul.f32 0.5, %v484_v39 }
 0x407   :  { %v479_v34 = vpop.f32.mrf.mxu1  ;;  %v496_v48 = vsub.f32 1.5, %v495_v41 }
 0x408   :  { %v770_v35 = vpop.eup %769  ;;  %v480_v36 = vadd.f32 1e-05, %v479_v34  ;;  %v486_v51 = vsub.f32 1.5, %v485_v43 }
 0x409   :  { %v503_v38 = vmul.f32 %v770_v35, %v477_v29  ;;  %vm509_vm3 = vweird.f32 %v770_v35  ;;  %v497_v55 = vmul.f32 %v766_v30, %v496_v48 }
 0x40a   :  { %771 = vrsqrt.f32 %v480_v36  ;;  %vm1031_vm8 = vmor %vm508_vm5, %vm509_vm3  ;;  %v487_v59 = vmul.f32 %v1014_v31, %v486_v51  ;;  %vm518_vm13 = vweird.f32 %v480_v36  ;;  %vm613_vm5 = vcmask 523264  }
 0x40b   :  { %v504_v40 = vmul.f32 %v770_v35, %v503_v38  ;;  %v501_v1 = vsel %vm500_vm11, %v766_v30, %v497_v55 }
 0x40c   :  { %v491_v6 = vsel %vm1044_vm12, %v1014_v31, %v487_v59  ;;  %v523_v9 = vmul.f32 %v501_v1, %v991_v8  ;;  %v574_v8 = vld [vmem:[%s1101_s6 + $0x28] sm:$0xff] }
 0x40d   :  { %v505_v42 = vmul.f32 0.5, %v504_v40  ;;  %v522_v13 = vmul.f32 %v491_v6, %v986_v5  ;;  %v573_v5 = vld [vmem:[%s1101_s6 + $0x20] sm:$0xff]  ;;  %600 = vmatpush.msra.mxu2 %v574_v8 }
 0x40e   :  { %vm527_vm3 = vcmp.ge.f32.partialorder %v523_v9, 0.0 }
 0x40f   :  { %v506_v44 = vsub.f32 1.5, %v505_v42  ;;  %v530_v18 = vmul.f32 0.2, %v522_v13  ;;  %vm526_vm4 = vcmp.ge.f32.partialorder %v522_v13, 0.0  ;;  %601 = vmatpush.msra.mxu2 %v573_v5 }
 0x410   :  { %v772_v45 = vpop.eup %771 }
 0x411   :  { %v513_v49 = vmul.f32 %v772_v45, %v480_v36  ;;  %v507_v52 = vmul.f32 %v770_v35, %v506_v44  ;;  %vm519_vm9 = vweird.f32 %v772_v45  ;;  %v534_v22 = vsel %vm526_vm4, %v522_v13, %v530_v18  ;;  %602 = vmatpush.msra.mxu2 %v572_v20 }
 0x412   :  { %vm520_vm14 = vmor %vm518_vm13, %vm519_vm9 }
 0x413   :  { %v514_v53 = vmul.f32 %v772_v45, %v513_v49  ;;  %v511_v61 = vsel %vm1031_vm8, %v770_v35, %v507_v52  ;;  %603 = vmatpush.msra.mxu2 %v571_v23 }
 0x414   :  { %v524_v2 = vmul.f32 %v511_v61, %v996_v11 }
 0x415   :  { %v515_v56 = vmul.f32 0.5, %v514_v53  ;;  %604 = vmatpush.msra.mxu2 %v570_v24 }
 0x416   :  { %v532_v12 = vmul.f32 0.2, %v524_v2  ;;  %vm528_vm2 = vcmp.ge.f32.partialorder %v524_v2, 0.0 }
 0x417   :  { %v516_v60 = vsub.f32 1.5, %v515_v56  ;;  %605 = vmatpush.msra.mxu2 %v569_v25 }
 0x418   :  { %v536_v17 = vsel %vm528_vm2, %v524_v2, %v532_v12 }
 0x419   :  { %v517_v0 = vmul.f32 %v772_v45, %v516_v60 }
 0x41b   :  { %v521_v4 = vsel %vm520_vm14, %v772_v45, %v517_v0 }
 0x41c   :  { %v525_v7 = vmul.f32 %v521_v4, %v1001_v14  ;;  %v531_v14 = vmul.f32 0.2, %v523_v9 }
 0x41e   :  { %vm529_vm15 = vcmp.ge.f32.partialorder %v525_v7, 0.0  ;;  %v533_v11 = vmul.f32 0.2, %v525_v7  ;;  %v535_v19 = vsel %vm527_vm3, %v523_v9, %v531_v14 }
 0x420   :  { %v537_v16 = vsel %vm529_vm15, %v525_v7, %v533_v11 }
 0x421   :  { %558 = vmatpush.msra.mxu3 %v537_v16 }
 0x423   :  { %559 = vmatpush.msra.mxu3 %v536_v17 }
 0x425   :  { %560 = vmatpush.msra.mxu3 %v535_v19 }
 0x427   :  { %561 = vmatpush.msra.mxu3 %v534_v22 }
 0x428   :  { %738 = vmatmul.msk.f32.vlgmr.msra.gmra.mxu3 %vm278_vm1, %v538_v21 }
 0x430   :  { %739 = vmatmul.msk.f32.gmra.mxu3 %vm278_vm1, %v539_v26 }
 0x4ab   :  { %v563_v27 = vpop.f32.mrf.mxu3 }
 0x4ac   :  { %740 = vmatmul.msk.f32.vlgmr.msra.gmra.mxu2 %vm236_vm0, %v563_v27 }
 0x4b3   :  { %v566_v28 = vpop.f32.mrf.mxu3 }
 0x4b4   :  { %741 = vmatmul.msk.f32.gmra.mxu2 %vm236_vm0, %v566_v28 }
 0x52f   :  { %v607_v29 = vpop.f32.mrf.mxu2 }
 0x530   :  { %614 = vst.msk [vmem:[#allocation2] sm:$0xff] %vm613_vm5, %v607_v29 }
 0x537   :  { %v610_v30 = vpop.f32.mrf.mxu2 }
 0x538   :  { %615 = vst.msk [vmem:[#allocation2 + $0x8] sm:$0xff] %vm613_vm5, %v610_v30 }
 0x539   :  { %628 = dma.vmem_to_hbm [thread:$0]  %s621_s21, 256, %s623_s23, [#allocation3], %s800_s5, %s800_s5, %s801_s24  }
 0x53a   :  { %797 = dma.done.wait [#allocation3], 256  }
 0x53b   :  { %798 = vsyncadd [#allocation3], 4294967040 }
 0x53c   :  { %633 = vsyncpa [#allocation3], 1 }

</bundles_post_ra>
